<compile_context>
chip_gen: v6e
topology: v6e:2x2x1
jax: 0.10.0
libtpu: 0.0.40
codegen_flags: <defaults>
</compile_context>

<pallas_src>
import functools

import jax
import jax.numpy as jnp
from jax.experimental import pallas as pl
from jax.experimental.pallas import tpu as pltpu


# ----------------------------------------------------------------------------
# Single fused kernel, gridded over node-row tiles:
#   encoders (online + target, both augmentations), predictor (both branches),
#   BYOL loss accumulation, supervised edge-gather accumulation, final
#   projection + loss finalize on the last tile.
# ----------------------------------------------------------------------------
def fused_forward_kernel(inv_n,
                         x1_ref, x2_ref, edge_ref, alpha_ref,
                         wo_ref, bo_ref, wt_ref, bt_ref,
                         w1_ref, b1_ref, w2_ref, b2_ref,
                         wst_ref, wsb_ref, bsup_ref,
                         loss_ref, logits_ref,
                         loss_acc, gsrc_acc, gdst_acc):
    i = pl.program_id(0)
    tm = x1_ref.shape[0]                 # rows in this tile (static)

    @pl.when(i == 0)
    def _init():
        loss_acc[...] = jnp.zeros_like(loss_acc)
        gsrc_acc[...] = jnp.zeros_like(gsrc_acc)
        gdst_acc[...] = jnp.zeros_like(gdst_acc)

    alpha = alpha_ref[0, 0]              # PReLU scalar (SMEM)

    x1 = x1_ref[...]                     # (TM, D) bf16  (aug1 node features)
    x2 = x2_ref[...]                     # (TM, D) bf16  (aug2 node features)
    wo = wo_ref[...]
    wt = wt_ref[...]
    bo = bo_ref[...]
    bt = bt_ref[...]

    # Encoders: separate dots per weight set keep every result lane-dense
    # (no mid-tile column slice of a concatenated output).
    o1 = jnp.dot(x1, wo, preferred_element_type=jnp.float32) + bo   # (TM, H) online(aug1)
    o2 = jnp.dot(x2, wo, preferred_element_type=jnp.float32) + bo   # (TM, H) online(aug2)
    t1 = jnp.dot(x1, wt, preferred_element_type=jnp.float32) + bt   # (TM, H) target(aug1), no-grad
    t2 = jnp.dot(x2, wt, preferred_element_type=jnp.float32) + bt   # (TM, H) target(aug2), no-grad

    # online_predictor: Linear(H, 2H) -> PReLU -> Linear(2H, H)
    def predictor(o):
        hmid = (jnp.dot(o.astype(jnp.bfloat16), w1_ref[...],
                        preferred_element_type=jnp.float32) + b1_ref[...])
        hmid = jnp.where(hmid >= 0.0, hmid, hmid * alpha)            # PReLU
        return (jnp.dot(hmid.astype(jnp.bfloat16), w2_ref[...],
                        preferred_element_type=jnp.float32) + b2_ref[...])

    p1 = predictor(o1)                   # (TM, H)
    p2 = predictor(o2)                   # (TM, H)

    # BYOL loss rows: 2 - 2 * <normalize(p), normalize(z)>; branch pairing is
    # (p1, t2) and (p2, t1) — no stacking, no roll, no concat needed.
    def byol_rows(p, z):
        eps2 = 1e-24
        p_inv = jax.lax.rsqrt(jnp.maximum(jnp.sum(p * p, -1, keepdims=True), eps2))
        z_inv = jax.lax.rsqrt(jnp.maximum(jnp.sum(z * z, -1, keepdims=True), eps2))
        cos = jnp.sum((p * p_inv) * (z * z_inv), -1, keepdims=True)
        return 2.0 - 2.0 * cos           # (TM, 1)

    per_row = byol_rows(p1, t2) + byol_rows(p2, t1)                   # (TM, 1)
    loss_acc[...] += jnp.sum(per_row, axis=0, keepdims=True)          # (1, 1)

    # Supervised edge gather (gather-then-project): bf16 one-hot restricted to
    # this tile's global row range; accumulate (E, H) gathered embeddings.
    edges = edge_ref[...]                                             # (E_pad, 2) int32
    node_id = (jax.lax.broadcasted_iota(jnp.int32, (edges.shape[0], tm), 1)
               + i * tm)                                              # global node ids
    oh_src = (node_id == edges[:, 0:1]).astype(jnp.bfloat16)          # (E_pad, TM)
    oh_dst = (node_id == edges[:, 1:2]).astype(jnp.bfloat16)
    o1b = o1.astype(jnp.bfloat16)
    gsrc_acc[...] += jnp.dot(oh_src, o1b, preferred_element_type=jnp.float32)
    gdst_acc[...] += jnp.dot(oh_dst, o1b, preferred_element_type=jnp.float32)

    @pl.when(i == pl.num_programs(0) - 1)
    def _finalize():
        # torch: (loss1 + loss2).mean() over N nodes == total sum / N
        loss_ref[...] = loss_acc[...] * inv_n
        # cat([src, dst], -1) @ W_sup == src @ W_top + dst @ W_bot  (+ bias)
        logits = (jnp.dot(gsrc_acc[...].astype(jnp.bfloat16), wst_ref[...],
                          preferred_element_type=jnp.float32)
                  + jnp.dot(gdst_acc[...].astype(jnp.bfloat16), wsb_ref[...],
                            preferred_element_type=jnp.float32)
                  + bsup_ref[...])                                    # (E_pad, 128)
        logits_ref[...] = logits


# ----------------------------------------------------------------------------
# Wrapper: parameter packing + single gridded pallas_call
# ----------------------------------------------------------------------------
@jax.jit
def pred_model_forward_train(aug1_x, aug2_x, edge_pair, params):
    n, d = aug1_x.shape
    h = params["w_enc"].shape[1]
    e = edge_pair.shape[0]

    # Row tile over nodes (v7x-friendly: per-tile live set, not whole-array).
    tm = n if n <= 256 else 256
    assert n % tm == 0, "node count must be divisible by the row tile"
    num_tiles = n // tm

    # Pad edges to a sublane multiple; index -1 never matches -> zero rows.
    e_pad = max(8, ((e + 7) // 8) * 8)
    edges = jnp.pad(edge_pair.astype(jnp.int32), ((0, e_pad - e), (0, 0)),
                    constant_values=-1)

    # Activations in bf16 (halves activation DMA); biases stay f32.
    x1 = aug1_x.astype(jnp.bfloat16)
    x2 = aug2_x.astype(jnp.bfloat16)

    wo = params["w_enc"].astype(jnp.bfloat16)
    wt = params["w_enc_t"].astype(jnp.bfloat16)
    bo = params["b_enc"]
    bt = params["b_enc_t"]
    w1 = params["w1"].astype(jnp.bfloat16)
    b1 = params["b1"]
    w2 = params["w2"].astype(jnp.bfloat16)
    b2 = params["b2"]

    # Supervised head padded to a lane-dense 128-wide output and split into
    # top/bottom halves (src/dst contributions).
    w_sup_pad = jnp.pad(params["w_sup"],
                        ((0, 0), (0, 128 - params["w_sup"].shape[1])))   # (2H, 128)
    b_sup_pad = jnp.pad(params["b_sup"],
                        ((0, 0), (0, 128 - params["b_sup"].shape[1])))   # (1, 128)
    wst = w_sup_pad[:h].astype(jnp.bfloat16)                             # (H, 128)
    wsb = w_sup_pad[h:].astype(jnp.bfloat16)                             # (H, 128)

    kernel = functools.partial(fused_forward_kernel, 1.0 / n)

    def full(shape):  # full-array resident block (weights / edges)
        return pl.BlockSpec(shape, lambda i: (0, 0))

    loss11, logits_pad = pl.pallas_call(
        kernel,
        grid=(num_tiles,),
        out_shape=(
            jax.ShapeDtypeStruct((1, 1), jnp.float32),       # BYOL loss (scalar)
            jax.ShapeDtypeStruct((e_pad, 128), jnp.float32),  # padded supervised logits
        ),
        in_specs=[
            pl.BlockSpec((tm, d), lambda i: (i, 0)),          # aug1 node features
            pl.BlockSpec((tm, d), lambda i: (i, 0)),          # aug2 node features
            full((e_pad, 2)),                                 # edge pairs (int32)
            pl.BlockSpec(memory_space=pltpu.MemorySpace.SMEM),  # PReLU alpha (1,1)
            full((d, h)), full((1, h)),                       # online encoder W, b
            full((d, h)), full((1, h)),                       # target encoder W, b
            full((h, 2 * h)), full((1, 2 * h)),               # predictor Linear 1
            full((2 * h, h)), full((1, h)),                   # predictor Linear 2
            full((h, 128)), full((h, 128)), full((1, 128)),   # supervised W_top, W_bot, b
        ],
        out_specs=(
            pl.BlockSpec((1, 1), lambda i: (0, 0)),
            pl.BlockSpec((e_pad, 128), lambda i: (0, 0)),
        ),
        scratch_shapes=[
            pltpu.VMEM((1, 1), jnp.float32),        # loss accumulator
            pltpu.VMEM((e_pad, h), jnp.float32),    # gathered src embeddings
            pltpu.VMEM((e_pad, h), jnp.float32),    # gathered dst embeddings
        ],
        compiler_params=pltpu.CompilerParams(
            dimension_semantics=("arbitrary",)),    # reduction axis (see TODO re v7x)
    )(x1, x2, edges, params["alpha"],
      wo, bo, wt, bt, w1, b1, w2, b2, wst, wsb, b_sup_pad)

    loss = loss11[0, 0]
    supervised_logit = logits_pad[:e, :2]
    return loss, supervised_logit


# ----------------------------------------------------------------------------
# Parameter construction (stand-in encoder + predictor heads)
# ----------------------------------------------------------------------------
def init_params(key, d_in, hidden):
    ks = jax.random.split(key, 6)
    s = lambda fan_in: 1.0 / jnp.sqrt(jnp.float32(fan_in))
    params = {
        # stand-in encoder (online); target_encoder = deepcopy -> identical weights
        "w_enc": jax.random.normal(ks[0], (d_in, hidden), jnp.float32) * s(d_in),
        "b_enc": jnp.zeros((1, hidden), jnp.float32),
        # online_predictor: Linear(H, 2H) -> PReLU -> Linear(2H, H)
        "w1": jax.random.normal(ks[1], (hidden, 2 * hidden), jnp.float32) * s(hidden),
        "b1": jax.random.normal(ks[2], (1, 2 * hidden), jnp.float32) * s(hidden),
        "alpha": jnp.full((1, 1), 0.25, jnp.float32),   # nn.PReLU() default init
        "w2": jax.random.normal(ks[3], (2 * hidden, hidden), jnp.float32) * s(2 * hidden),
        "b2": jax.random.normal(ks[4], (1, hidden), jnp.float32) * s(2 * hidden),
        # supervised_predictor: Linear(2H, 2)
        "w_sup": jax.random.normal(ks[5], (2 * hidden, 2), jnp.float32) * s(2 * hidden),
        "b_sup": jnp.zeros((1, 2), jnp.float32),
    }
    # target encoder = deepcopy(online_encoder), frozen (EMA updates not modeled)
    params["w_enc_t"] = params["w_enc"]
    params["b_enc_t"] = params["b_enc"]
    return params


if __name__ == "__main__":
    N = 16          # nodes
    D_IN = 16       # raw node-feature dim
    HIDDEN = 32     # args.g_hidden_dim
    E = 8           # number of edge pairs

    key = jax.random.PRNGKey(0)
    k_a1, k_a2, k_e, k_p = jax.random.split(key, 4)

    aug1_x = jax.random.normal(k_a1, (N, D_IN), jnp.float32)
    aug2_x = jax.random.normal(k_a2, (N, D_IN), jnp.float32)
    edge_pair = jax.random.randint(k_e, (E, 2), 0, N, dtype=jnp.int32)

    params = init_params(k_p, D_IN, HIDDEN)

    loss, logits = pred_model_forward_train(aug1_x, aug2_x, edge_pair, params)
    jax.block_until_ready((loss, logits))

    assert logits.shape == (E, 2)
    assert loss.shape == ()
    assert bool(jnp.isfinite(loss))
    assert bool(jnp.all(jnp.isfinite(logits)))
    print("KERNEL_OK")
</pallas_src>

<mosaic_0001>
module attributes {stable_mosaic.version = 11 : i64} {
  func.func @fused_forward_kernel(%arg0: i32, %arg1: memref<16x16xbf16, #tpu.memory_space<vmem>>, %arg2: memref<16x16xbf16, #tpu.memory_space<vmem>>, %arg3: memref<8x2xi32, #tpu.memory_space<vmem>>, %arg4: memref<1x1xf32, #tpu.memory_space<smem>>, %arg5: memref<16x32xbf16, #tpu.memory_space<vmem>>, %arg6: memref<1x32xf32, #tpu.memory_space<vmem>>, %arg7: memref<16x32xbf16, #tpu.memory_space<vmem>>, %arg8: memref<1x32xf32, #tpu.memory_space<vmem>>, %arg9: memref<32x64xbf16, #tpu.memory_space<vmem>>, %arg10: memref<1x64xf32, #tpu.memory_space<vmem>>, %arg11: memref<64x32xbf16, #tpu.memory_space<vmem>>, %arg12: memref<1x32xf32, #tpu.memory_space<vmem>>, %arg13: memref<32x128xbf16, #tpu.memory_space<vmem>>, %arg14: memref<32x128xbf16, #tpu.memory_space<vmem>>, %arg15: memref<1x128xf32, #tpu.memory_space<vmem>>, %arg16: memref<1x1xf32, #tpu.memory_space<vmem>>, %arg17: memref<8x128xf32, #tpu.memory_space<vmem>>, %arg18: memref<1x1xf32, #tpu.memory_space<vmem>>, %arg19: memref<8x32xf32, #tpu.memory_space<vmem>>, %arg20: memref<8x32xf32, #tpu.memory_space<vmem>>) attributes {dimension_semantics = [#tpu.dimension_semantics<arbitrary>], iteration_bounds = array<i64: 1>, scalar_prefetch = 0 : i64, scratch_operands = 3 : i64, tpu.core_type = #tpu.core_type<tc>, window_params = [{transform_indices = @transform_0, window_bounds = array<i64: 16, 16>}, {transform_indices = @transform_1, window_bounds = array<i64: 16, 16>}, {pipeline_mode = #tpu.pipeline_mode<synchronous>, transform_indices = @transform_2, window_bounds = array<i64: 8, 2>}, {transform_indices = @transform_3, window_bounds = array<i64: 1, 1>}, {pipeline_mode = #tpu.pipeline_mode<synchronous>, transform_indices = @transform_4, window_bounds = array<i64: 16, 32>}, {pipeline_mode = #tpu.pipeline_mode<synchronous>, transform_indices = @transform_5, window_bounds = array<i64: 1, 32>}, {pipeline_mode = #tpu.pipeline_mode<synchronous>, transform_indices = @transform_6, window_bounds = array<i64: 16, 32>}, {pipeline_mode = #tpu.pipeline_mode<synchronous>, transform_indices = @transform_7, window_bounds = array<i64: 1, 32>}, {pipeline_mode = #tpu.pipeline_mode<synchronous>, transform_indices = @transform_8, window_bounds = array<i64: 32, 64>}, {pipeline_mode = #tpu.pipeline_mode<synchronous>, transform_indices = @transform_9, window_bounds = array<i64: 1, 64>}, {pipeline_mode = #tpu.pipeline_mode<synchronous>, transform_indices = @transform_10, window_bounds = array<i64: 64, 32>}, {pipeline_mode = #tpu.pipeline_mode<synchronous>, transform_indices = @transform_11, window_bounds = array<i64: 1, 32>}, {pipeline_mode = #tpu.pipeline_mode<synchronous>, transform_indices = @transform_12, window_bounds = array<i64: 32, 128>}, {pipeline_mode = #tpu.pipeline_mode<synchronous>, transform_indices = @transform_13, window_bounds = array<i64: 32, 128>}, {pipeline_mode = #tpu.pipeline_mode<synchronous>, transform_indices = @transform_14, window_bounds = array<i64: 1, 128>}, {pipeline_mode = #tpu.pipeline_mode<synchronous>, transform_indices = @transform_15, window_bounds = array<i64: 1, 1>}, {pipeline_mode = #tpu.pipeline_mode<synchronous>, transform_indices = @transform_16, window_bounds = array<i64: 8, 128>}]} {
    %c0_i32 = arith.constant 0 : i32
    %0 = arith.cmpi eq, %arg0, %c0_i32 : i32
    %1 = arith.extui %0 : i1 to i32
    %c0_i32_0 = arith.constant 0 : i32
    %2 = arith.cmpi ne, %1, %c0_i32_0 : i32
    scf.if %2 {
      %cst_72 = arith.constant 0.000000e+00 : f32
      %137 = vector.broadcast %cst_72 : f32 to vector<1x1xf32>
      %c0_73 = arith.constant 0 : index
      %c0_74 = arith.constant 0 : index
      %138 = vector.load %arg18[%c0_73, %c0_74] : memref<1x1xf32, #tpu.memory_space<vmem>>, vector<1x1xf32>
      tpu.vector_store %arg18[%c0_73, %c0_74], %137 {strides = array<i32>} : memref<1x1xf32, #tpu.memory_space<vmem>>, vector<1x1xf32>,
      %cst_75 = arith.constant 0.000000e+00 : f32
      %139 = vector.broadcast %cst_75 : f32 to vector<8x32xf32>
      %c0_76 = arith.constant 0 : index
      %c0_77 = arith.constant 0 : index
      %140 = vector.load %arg19[%c0_76, %c0_77] : memref<8x32xf32, #tpu.memory_space<vmem>>, vector<8x32xf32>
      tpu.vector_store %arg19[%c0_76, %c0_77], %139 {strides = array<i32>} : memref<8x32xf32, #tpu.memory_space<vmem>>, vector<8x32xf32>,
      %cst_78 = arith.constant 0.000000e+00 : f32
      %141 = vector.broadcast %cst_78 : f32 to vector<8x32xf32>
      %c0_79 = arith.constant 0 : index
      %c0_80 = arith.constant 0 : index
      %142 = vector.load %arg20[%c0_79, %c0_80] : memref<8x32xf32, #tpu.memory_space<vmem>>, vector<8x32xf32>
      tpu.vector_store %arg20[%c0_79, %c0_80], %141 {strides = array<i32>} : memref<8x32xf32, #tpu.memory_space<vmem>>, vector<8x32xf32>,
    } else {
    }
    %c0 = arith.constant 0 : index
    %c0_1 = arith.constant 0 : index
    %3 = memref.load %arg4[%c0, %c0_1] : memref<1x1xf32, #tpu.memory_space<smem>>
    %c0_2 = arith.constant 0 : index
    %c0_3 = arith.constant 0 : index
    %4 = vector.load %arg1[%c0_2, %c0_3] : memref<16x16xbf16, #tpu.memory_space<vmem>>, vector<16x16xbf16>
    %c0_4 = arith.constant 0 : index
    %c0_5 = arith.constant 0 : index
    %5 = vector.load %arg2[%c0_4, %c0_5] : memref<16x16xbf16, #tpu.memory_space<vmem>>, vector<16x16xbf16>
    %c0_6 = arith.constant 0 : index
    %c0_7 = arith.constant 0 : index
    %6 = vector.load %arg5[%c0_6, %c0_7] : memref<16x32xbf16, #tpu.memory_space<vmem>>, vector<16x32xbf16>
    %c0_8 = arith.constant 0 : index
    %c0_9 = arith.constant 0 : index
    %7 = vector.load %arg7[%c0_8, %c0_9] : memref<16x32xbf16, #tpu.memory_space<vmem>>, vector<16x32xbf16>
    %c0_10 = arith.constant 0 : index
    %c0_11 = arith.constant 0 : index
    %8 = vector.load %arg6[%c0_10, %c0_11] : memref<1x32xf32, #tpu.memory_space<vmem>>, vector<1x32xf32>
    %c0_12 = arith.constant 0 : index
    %c0_13 = arith.constant 0 : index
    %9 = vector.load %arg8[%c0_12, %c0_13] : memref<1x32xf32, #tpu.memory_space<vmem>>, vector<1x32xf32>
    %cst = arith.constant dense<0.000000e+00> : vector<16x32xf32>
    %10 = tpu.matmul %4, %6, %cst {dimension_numbers = #tpu.dot_dimension_numbers<[1], [0], [0], [1], [0, 0, 1, 1], [], []>} : vector<16x16xbf16>, vector<16x32xbf16>, vector<16x32xf32> -> vector<16x32xf32>
    %11 = vector.broadcast %8 : vector<1x32xf32> to vector<16x32xf32>
    %12 = arith.addf %10, %11 : vector<16x32xf32>
    %cst_14 = arith.constant dense<0.000000e+00> : vector<16x32xf32>
    %13 = tpu.matmul %5, %6, %cst_14 {dimension_numbers = #tpu.dot_dimension_numbers<[1], [0], [0], [1], [0, 0, 1, 1], [], []>} : vector<16x16xbf16>, vector<16x32xbf16>, vector<16x32xf32> -> vector<16x32xf32>
    %14 = vector.broadcast %8 : vector<1x32xf32> to vector<16x32xf32>
    %15 = arith.addf %13, %14 : vector<16x32xf32>
    %cst_15 = arith.constant dense<0.000000e+00> : vector<16x32xf32>
    %16 = tpu.matmul %4, %7, %cst_15 {dimension_numbers = #tpu.dot_dimension_numbers<[1], [0], [0], [1], [0, 0, 1, 1], [], []>} : vector<16x16xbf16>, vector<16x32xbf16>, vector<16x32xf32> -> vector<16x32xf32>
    %17 = vector.broadcast %9 : vector<1x32xf32> to vector<16x32xf32>
    %18 = arith.addf %16, %17 : vector<16x32xf32>
    %cst_16 = arith.constant dense<0.000000e+00> : vector<16x32xf32>
    %19 = tpu.matmul %5, %7, %cst_16 {dimension_numbers = #tpu.dot_dimension_numbers<[1], [0], [0], [1], [0, 0, 1, 1], [], []>} : vector<16x16xbf16>, vector<16x32xbf16>, vector<16x32xf32> -> vector<16x32xf32>
    %20 = vector.broadcast %9 : vector<1x32xf32> to vector<16x32xf32>
    %21 = arith.addf %19, %20 : vector<16x32xf32>
    %22 = arith.truncf %12 : vector<16x32xf32> to vector<16x32xbf16>
    %c0_17 = arith.constant 0 : index
    %c0_18 = arith.constant 0 : index
    %23 = vector.load %arg9[%c0_17, %c0_18] : memref<32x64xbf16, #tpu.memory_space<vmem>>, vector<32x64xbf16>
    %cst_19 = arith.constant dense<0.000000e+00> : vector<16x64xf32>
    %24 = tpu.matmul %22, %23, %cst_19 {dimension_numbers = #tpu.dot_dimension_numbers<[1], [0], [0], [1], [0, 0, 1, 1], [], []>} : vector<16x32xbf16>, vector<32x64xbf16>, vector<16x64xf32> -> vector<16x64xf32>
    %c0_20 = arith.constant 0 : index
    %c0_21 = arith.constant 0 : index
    %25 = vector.load %arg10[%c0_20, %c0_21] : memref<1x64xf32, #tpu.memory_space<vmem>>, vector<1x64xf32>
    %26 = vector.broadcast %25 : vector<1x64xf32> to vector<16x64xf32>
    %27 = arith.addf %24, %26 : vector<16x64xf32>
    %cst_22 = arith.constant 0.000000e+00 : f32
    %28 = vector.broadcast %cst_22 : f32 to vector<16x64xf32>
    %29 = arith.cmpf oge, %27, %28 : vector<16x64xf32>
    %30 = vector.broadcast %3 : f32 to vector<16x64xf32>
    %31 = arith.mulf %27, %30 : vector<16x64xf32>
    %32 = arith.select %29, %27, %31 : vector<16x64xi1>, vector<16x64xf32>
    %33 = arith.truncf %32 : vector<16x64xf32> to vector<16x64xbf16>
    %c0_23 = arith.constant 0 : index
    %c0_24 = arith.constant 0 : index
    %34 = vector.load %arg11[%c0_23, %c0_24] : memref<64x32xbf16, #tpu.memory_space<vmem>>, vector<64x32xbf16>
    %cst_25 = arith.constant dense<0.000000e+00> : vector<16x32xf32>
    %35 = tpu.matmul %33, %34, %cst_25 {dimension_numbers = #tpu.dot_dimension_numbers<[1], [0], [0], [1], [0, 0, 1, 1], [], []>} : vector<16x64xbf16>, vector<64x32xbf16>, vector<16x32xf32> -> vector<16x32xf32>
    %c0_26 = arith.constant 0 : index
    %c0_27 = arith.constant 0 : index
    %36 = vector.load %arg12[%c0_26, %c0_27] : memref<1x32xf32, #tpu.memory_space<vmem>>, vector<1x32xf32>
    %37 = vector.broadcast %36 : vector<1x32xf32> to vector<16x32xf32>
    %38 = arith.addf %35, %37 : vector<16x32xf32>
    %39 = arith.truncf %15 : vector<16x32xf32> to vector<16x32xbf16>
    %c0_28 = arith.constant 0 : index
    %c0_29 = arith.constant 0 : index
    %40 = vector.load %arg9[%c0_28, %c0_29] : memref<32x64xbf16, #tpu.memory_space<vmem>>, vector<32x64xbf16>
    %cst_30 = arith.constant dense<0.000000e+00> : vector<16x64xf32>
    %41 = tpu.matmul %39, %40, %cst_30 {dimension_numbers = #tpu.dot_dimension_numbers<[1], [0], [0], [1], [0, 0, 1, 1], [], []>} : vector<16x32xbf16>, vector<32x64xbf16>, vector<16x64xf32> -> vector<16x64xf32>
    %c0_31 = arith.constant 0 : index
    %c0_32 = arith.constant 0 : index
    %42 = vector.load %arg10[%c0_31, %c0_32] : memref<1x64xf32, #tpu.memory_space<vmem>>, vector<1x64xf32>
    %43 = vector.broadcast %42 : vector<1x64xf32> to vector<16x64xf32>
    %44 = arith.addf %41, %43 : vector<16x64xf32>
    %cst_33 = arith.constant 0.000000e+00 : f32
    %45 = vector.broadcast %cst_33 : f32 to vector<16x64xf32>
    %46 = arith.cmpf oge, %44, %45 : vector<16x64xf32>
    %47 = vector.broadcast %3 : f32 to vector<16x64xf32>
    %48 = arith.mulf %44, %47 : vector<16x64xf32>
    %49 = arith.select %46, %44, %48 : vector<16x64xi1>, vector<16x64xf32>
    %50 = arith.truncf %49 : vector<16x64xf32> to vector<16x64xbf16>
    %c0_34 = arith.constant 0 : index
    %c0_35 = arith.constant 0 : index
    %51 = vector.load %arg11[%c0_34, %c0_35] : memref<64x32xbf16, #tpu.memory_space<vmem>>, vector<64x32xbf16>
    %cst_36 = arith.constant dense<0.000000e+00> : vector<16x32xf32>
    %52 = tpu.matmul %50, %51, %cst_36 {dimension_numbers = #tpu.dot_dimension_numbers<[1], [0], [0], [1], [0, 0, 1, 1], [], []>} : vector<16x64xbf16>, vector<64x32xbf16>, vector<16x32xf32> -> vector<16x32xf32>
    %c0_37 = arith.constant 0 : index
    %c0_38 = arith.constant 0 : index
    %53 = vector.load %arg12[%c0_37, %c0_38] : memref<1x32xf32, #tpu.memory_space<vmem>>, vector<1x32xf32>
    %54 = vector.broadcast %53 : vector<1x32xf32> to vector<16x32xf32>
    %55 = arith.addf %52, %54 : vector<16x32xf32>
    %56 = arith.mulf %38, %38 : vector<16x32xf32>
    %cst_39 = arith.constant dense<0.000000e+00> : vector<16xf32>
    %57 = vector.multi_reduction <add>, %56, %cst_39 [1] : vector<16x32xf32> to vector<16xf32>
    %58 = vector.shape_cast %57 : vector<16xf32> to vector<16x1xf32>
    %cst_40 = arith.constant 1.000000e-24 : f32
    %59 = vector.broadcast %cst_40 : f32 to vector<16x1xf32>
    %60 = arith.maximumf %58, %59 : vector<16x1xf32>
    %61 = math.rsqrt %60 : vector<16x1xf32>
    %62 = arith.mulf %21, %21 : vector<16x32xf32>
    %cst_41 = arith.constant dense<0.000000e+00> : vector<16xf32>
    %63 = vector.multi_reduction <add>, %62, %cst_41 [1] : vector<16x32xf32> to vector<16xf32>
    %64 = vector.shape_cast %63 : vector<16xf32> to vector<16x1xf32>
    %cst_42 = arith.constant 1.000000e-24 : f32
    %65 = vector.broadcast %cst_42 : f32 to vector<16x1xf32>
    %66 = arith.maximumf %64, %65 : vector<16x1xf32>
    %67 = math.rsqrt %66 : vector<16x1xf32>
    %68 = vector.broadcast %61 : vector<16x1xf32> to vector<16x32xf32>
    %69 = arith.mulf %38, %68 : vector<16x32xf32>
    %70 = vector.broadcast %67 : vector<16x1xf32> to vector<16x32xf32>
    %71 = arith.mulf %21, %70 : vector<16x32xf32>
    %72 = arith.mulf %69, %71 : vector<16x32xf32>
    %cst_43 = arith.constant dense<0.000000e+00> : vector<16xf32>
    %73 = vector.multi_reduction <add>, %72, %cst_43 [1] : vector<16x32xf32> to vector<16xf32>
    %74 = vector.shape_cast %73 : vector<16xf32> to vector<16x1xf32>
    %cst_44 = arith.constant 2.000000e+00 : f32
    %75 = vector.broadcast %cst_44 : f32 to vector<16x1xf32>
    %76 = arith.mulf %75, %74 : vector<16x1xf32>
    %cst_45 = arith.constant 2.000000e+00 : f32
    %77 = vector.broadcast %cst_45 : f32 to vector<16x1xf32>
    %78 = arith.subf %77, %76 : vector<16x1xf32>
    %79 = arith.mulf %55, %55 : vector<16x32xf32>
    %cst_46 = arith.constant dense<0.000000e+00> : vector<16xf32>
    %80 = vector.multi_reduction <add>, %79, %cst_46 [1] : vector<16x32xf32> to vector<16xf32>
    %81 = vector.shape_cast %80 : vector<16xf32> to vector<16x1xf32>
    %cst_47 = arith.constant 1.000000e-24 : f32
    %82 = vector.broadcast %cst_47 : f32 to vector<16x1xf32>
    %83 = arith.maximumf %81, %82 : vector<16x1xf32>
    %84 = math.rsqrt %83 : vector<16x1xf32>
    %85 = arith.mulf %18, %18 : vector<16x32xf32>
    %cst_48 = arith.constant dense<0.000000e+00> : vector<16xf32>
    %86 = vector.multi_reduction <add>, %85, %cst_48 [1] : vector<16x32xf32> to vector<16xf32>
    %87 = vector.shape_cast %86 : vector<16xf32> to vector<16x1xf32>
    %cst_49 = arith.constant 1.000000e-24 : f32
    %88 = vector.broadcast %cst_49 : f32 to vector<16x1xf32>
    %89 = arith.maximumf %87, %88 : vector<16x1xf32>
    %90 = math.rsqrt %89 : vector<16x1xf32>
    %91 = vector.broadcast %84 : vector<16x1xf32> to vector<16x32xf32>
    %92 = arith.mulf %55, %91 : vector<16x32xf32>
    %93 = vector.broadcast %90 : vector<16x1xf32> to vector<16x32xf32>
    %94 = arith.mulf %18, %93 : vector<16x32xf32>
    %95 = arith.mulf %92, %94 : vector<16x32xf32>
    %cst_50 = arith.constant dense<0.000000e+00> : vector<16xf32>
    %96 = vector.multi_reduction <add>, %95, %cst_50 [1] : vector<16x32xf32> to vector<16xf32>
    %97 = vector.shape_cast %96 : vector<16xf32> to vector<16x1xf32>
    %cst_51 = arith.constant 2.000000e+00 : f32
    %98 = vector.broadcast %cst_51 : f32 to vector<16x1xf32>
    %99 = arith.mulf %98, %97 : vector<16x1xf32>
    %cst_52 = arith.constant 2.000000e+00 : f32
    %100 = vector.broadcast %cst_52 : f32 to vector<16x1xf32>
    %101 = arith.subf %100, %99 : vector<16x1xf32>
    %102 = arith.addf %78, %101 : vector<16x1xf32>
    %c0_53 = arith.constant 0 : index
    %c0_54 = arith.constant 0 : index
    %103 = vector.load %arg18[%c0_53, %c0_54] : memref<1x1xf32, #tpu.memory_space<vmem>>, vector<1x1xf32>
    %cst_55 = arith.constant dense<0.000000e+00> : vector<1xf32>
    %104 = vector.multi_reduction <add>, %102, %cst_55 [0] : vector<16x1xf32> to vector<1xf32>
    %105 = vector.shape_cast %104 : vector<1xf32> to vector<1x1xf32>
    %106 = arith.addf %103, %105 : vector<1x1xf32>
    %c0_56 = arith.constant 0 : index
    %c0_57 = arith.constant 0 : index
    %107 = vector.load %arg18[%c0_56, %c0_57] : memref<1x1xf32, #tpu.memory_space<vmem>>, vector<1x1xf32>
    tpu.vector_store %arg18[%c0_56, %c0_57], %106 {strides = array<i32>} : memref<1x1xf32, #tpu.memory_space<vmem>>, vector<1x1xf32>,
    %c0_58 = arith.constant 0 : index
    %c0_59 = arith.constant 0 : index
    %108 = vector.load %arg3[%c0_58, %c0_59] : memref<8x2xi32, #tpu.memory_space<vmem>>, vector<8x2xi32>
    %109 = tpu.iota {dimensions = array<i32: 1>} : vector<8x16xi32>
    %c16_i32 = arith.constant 16 : i32
    %110 = arith.muli %arg0, %c16_i32 : i32
    %111 = vector.broadcast %110 : i32 to vector<8x16xi32>
    %112 = arith.addi %109, %111 : vector<8x16xi32>
    %113 = vector.extract_strided_slice %108 {offsets = [0, 0], sizes = [8, 1], strides = [1, 1]} : vector<8x2xi32> to vector<8x1xi32>
    %114 = vector.broadcast %113 : vector<8x1xi32> to vector<8x16xi32>
    %115 = arith.cmpi eq, %112, %114 : vector<8x16xi32>
    %116 = arith.extui %115 : vector<8x16xi1> to vector<8x16xi32>
    %117 = arith.sitofp %116 : vector<8x16xi32> to vector<8x16xf32>
    %118 = arith.truncf %117 : vector<8x16xf32> to vector<8x16xbf16>
    %119 = vector.extract_strided_slice %108 {offsets = [0, 1], sizes = [8, 1], strides = [1, 1]} : vector<8x2xi32> to vector<8x1xi32>
    %120 = vector.broadcast %119 : vector<8x1xi32> to vector<8x16xi32>
    %121 = arith.cmpi eq, %112, %120 : vector<8x16xi32>
    %122 = arith.extui %121 : vector<8x16xi1> to vector<8x16xi32>
    %123 = arith.sitofp %122 : vector<8x16xi32> to vector<8x16xf32>
    %124 = arith.truncf %123 : vector<8x16xf32> to vector<8x16xbf16>
    %125 = arith.truncf %12 : vector<16x32xf32> to vector<16x32xbf16>
    %c0_60 = arith.constant 0 : index
    %c0_61 = arith.constant 0 : index
    %126 = vector.load %arg19[%c0_60, %c0_61] : memref<8x32xf32, #tpu.memory_space<vmem>>, vector<8x32xf32>
    %cst_62 = arith.constant dense<0.000000e+00> : vector<8x32xf32>
    %127 = tpu.matmul %118, %125, %cst_62 {dimension_numbers = #tpu.dot_dimension_numbers<[1], [0], [0], [1], [0, 0, 1, 1], [], []>} : vector<8x16xbf16>, vector<16x32xbf16>, vector<8x32xf32> -> vector<8x32xf32>
    %128 = arith.addf %126, %127 : vector<8x32xf32>
    %c0_63 = arith.constant 0 : index
    %c0_64 = arith.constant 0 : index
    %129 = vector.load %arg19[%c0_63, %c0_64] : memref<8x32xf32, #tpu.memory_space<vmem>>, vector<8x32xf32>
    tpu.vector_store %arg19[%c0_63, %c0_64], %128 {strides = array<i32>} : memref<8x32xf32, #tpu.memory_space<vmem>>, vector<8x32xf32>,
    %c0_65 = arith.constant 0 : index
    %c0_66 = arith.constant 0 : index
    %130 = vector.load %arg20[%c0_65, %c0_66] : memref<8x32xf32, #tpu.memory_space<vmem>>, vector<8x32xf32>
    %cst_67 = arith.constant dense<0.000000e+00> : vector<8x32xf32>
    %131 = tpu.matmul %124, %125, %cst_67 {dimension_numbers = #tpu.dot_dimension_numbers<[1], [0], [0], [1], [0, 0, 1, 1], [], []>} : vector<8x16xbf16>, vector<16x32xbf16>, vector<8x32xf32> -> vector<8x32xf32>
    %132 = arith.addf %130, %131 : vector<8x32xf32>
    %c0_68 = arith.constant 0 : index
    %c0_69 = arith.constant 0 : index
    %133 = vector.load %arg20[%c0_68, %c0_69] : memref<8x32xf32, #tpu.memory_space<vmem>>, vector<8x32xf32>
    tpu.vector_store %arg20[%c0_68, %c0_69], %132 {strides = array<i32>} : memref<8x32xf32, #tpu.memory_space<vmem>>, vector<8x32xf32>,
    %c0_i32_70 = arith.constant 0 : i32
    %134 = arith.cmpi eq, %arg0, %c0_i32_70 : i32
    %135 = arith.extui %134 : i1 to i32
    %c0_i32_71 = arith.constant 0 : i32
    %136 = arith.cmpi ne, %135, %c0_i32_71 : i32
    scf.if %136 {
      %c0_72 = arith.constant 0 : index
      %c0_73 = arith.constant 0 : index
      %137 = vector.load %arg18[%c0_72, %c0_73] : memref<1x1xf32, #tpu.memory_space<vmem>>, vector<1x1xf32>
      %cst_74 = arith.constant 6.250000e-02 : f32
      %138 = vector.broadcast %cst_74 : f32 to vector<1x1xf32>
      %139 = arith.mulf %137, %138 : vector<1x1xf32>
      %c0_75 = arith.constant 0 : index
      %c0_76 = arith.constant 0 : index
      %140 = vector.load %arg16[%c0_75, %c0_76] : memref<1x1xf32, #tpu.memory_space<vmem>>, vector<1x1xf32>
      tpu.vector_store %arg16[%c0_75, %c0_76], %139 {strides = array<i32>} : memref<1x1xf32, #tpu.memory_space<vmem>>, vector<1x1xf32>,
      %c0_77 = arith.constant 0 : index
      %c0_78 = arith.constant 0 : index
      %141 = vector.load %arg19[%c0_77, %c0_78] : memref<8x32xf32, #tpu.memory_space<vmem>>, vector<8x32xf32>
      %142 = arith.truncf %141 : vector<8x32xf32> to vector<8x32xbf16>
      %c0_79 = arith.constant 0 : index
      %c0_80 = arith.constant 0 : index
      %143 = vector.load %arg13[%c0_79, %c0_80] : memref<32x128xbf16, #tpu.memory_space<vmem>>, vector<32x128xbf16>
      %cst_81 = arith.constant dense<0.000000e+00> : vector<8x128xf32>
      %144 = tpu.matmul %142, %143, %cst_81 {dimension_numbers = #tpu.dot_dimension_numbers<[1], [0], [0], [1], [0, 0, 1, 1], [], []>} : vector<8x32xbf16>, vector<32x128xbf16>, vector<8x128xf32> -> vector<8x128xf32>
      %c0_82 = arith.constant 0 : index
      %c0_83 = arith.constant 0 : index
      %145 = vector.load %arg20[%c0_82, %c0_83] : memref<8x32xf32, #tpu.memory_space<vmem>>, vector<8x32xf32>
      %146 = arith.truncf %145 : vector<8x32xf32> to vector<8x32xbf16>
      %c0_84 = arith.constant 0 : index
      %c0_85 = arith.constant 0 : index
      %147 = vector.load %arg14[%c0_84, %c0_85] : memref<32x128xbf16, #tpu.memory_space<vmem>>, vector<32x128xbf16>
      %cst_86 = arith.constant dense<0.000000e+00> : vector<8x128xf32>
      %148 = tpu.matmul %146, %147, %cst_86 {dimension_numbers = #tpu.dot_dimension_numbers<[1], [0], [0], [1], [0, 0, 1, 1], [], []>} : vector<8x32xbf16>, vector<32x128xbf16>, vector<8x128xf32> -> vector<8x128xf32>
      %149 = arith.addf %144, %148 : vector<8x128xf32>
      %c0_87 = arith.constant 0 : index
      %c0_88 = arith.constant 0 : index
      %150 = vector.load %arg15[%c0_87, %c0_88] : memref<1x128xf32, #tpu.memory_space<vmem>>, vector<1x128xf32>
      %151 = vector.broadcast %150 : vector<1x128xf32> to vector<8x128xf32>
      %152 = arith.addf %149, %151 : vector<8x128xf32>
      %c0_89 = arith.constant 0 : index
      %c0_90 = arith.constant 0 : index
      %153 = vector.load %arg17[%c0_89, %c0_90] : memref<8x128xf32, #tpu.memory_space<vmem>>, vector<8x128xf32>
      tpu.vector_store %arg17[%c0_89, %c0_90], %152 {strides = array<i32>} : memref<8x128xf32, #tpu.memory_space<vmem>>, vector<8x128xf32>,
    } else {
    }
    return
  }
  func.func @transform_0(%arg0: i32) -> (i32, i32) {
    %c0_i32 = arith.constant 0 : i32
    %c0_i32_0 = arith.constant 0 : i32
    return %arg0, %c0_i32 : i32, i32
  }
  func.func @transform_1(%arg0: i32) -> (i32, i32) {
    %c0_i32 = arith.constant 0 : i32
    %c0_i32_0 = arith.constant 0 : i32
    return %arg0, %c0_i32 : i32, i32
  }
  func.func @transform_2(%arg0: i32) -> (i32, i32) {
    %c0_i32 = arith.constant 0 : i32
    %c0_i32_0 = arith.constant 0 : i32
    %c0_i32_1 = arith.constant 0 : i32
    return %c0_i32, %c0_i32_0 : i32, i32
  }
  func.func @transform_3(%arg0: i32) -> (i32, i32) {
    %c0_i32 = arith.constant 0 : i32
    %c0_i32_0 = arith.constant 0 : i32
    %c0_i32_1 = arith.constant 0 : i32
    return %c0_i32, %c0_i32_0 : i32, i32
  }
  func.func @transform_4(%arg0: i32) -> (i32, i32) {
    %c0_i32 = arith.constant 0 : i32
    %c0_i32_0 = arith.constant 0 : i32
    %c0_i32_1 = arith.constant 0 : i32
    return %c0_i32, %c0_i32_0 : i32, i32
  }
  func.func @transform_5(%arg0: i32) -> (i32, i32) {
    %c0_i32 = arith.constant 0 : i32
    %c0_i32_0 = arith.constant 0 : i32
    %c0_i32_1 = arith.constant 0 : i32
    return %c0_i32, %c0_i32_0 : i32, i32
  }
  func.func @transform_6(%arg0: i32) -> (i32, i32) {
    %c0_i32 = arith.constant 0 : i32
    %c0_i32_0 = arith.constant 0 : i32
    %c0_i32_1 = arith.constant 0 : i32
    return %c0_i32, %c0_i32_0 : i32, i32
  }
  func.func @transform_7(%arg0: i32) -> (i32, i32) {
    %c0_i32 = arith.constant 0 : i32
    %c0_i32_0 = arith.constant 0 : i32
    %c0_i32_1 = arith.constant 0 : i32
    return %c0_i32, %c0_i32_0 : i32, i32
  }
  func.func @transform_8(%arg0: i32) -> (i32, i32) {
    %c0_i32 = arith.constant 0 : i32
    %c0_i32_0 = arith.constant 0 : i32
    %c0_i32_1 = arith.constant 0 : i32
    return %c0_i32, %c0_i32_0 : i32, i32
  }
  func.func @transform_9(%arg0: i32) -> (i32, i32) {
    %c0_i32 = arith.constant 0 : i32
    %c0_i32_0 = arith.constant 0 : i32
    %c0_i32_1 = arith.constant 0 : i32
    return %c0_i32, %c0_i32_0 : i32, i32
  }
  func.func @transform_10(%arg0: i32) -> (i32, i32) {
    %c0_i32 = arith.constant 0 : i32
    %c0_i32_0 = arith.constant 0 : i32
    %c0_i32_1 = arith.constant 0 : i32
    return %c0_i32, %c0_i32_0 : i32, i32
  }
  func.func @transform_11(%arg0: i32) -> (i32, i32) {
    %c0_i32 = arith.constant 0 : i32
    %c0_i32_0 = arith.constant 0 : i32
    %c0_i32_1 = arith.constant 0 : i32
    return %c0_i32, %c0_i32_0 : i32, i32
  }
  func.func @transform_12(%arg0: i32) -> (i32, i32) {
    %c0_i32 = arith.constant 0 : i32
    %c0_i32_0 = arith.constant 0 : i32
    %c0_i32_1 = arith.constant 0 : i32
    return %c0_i32, %c0_i32_0 : i32, i32
  }
  func.func @transform_13(%arg0: i32) -> (i32, i32) {
    %c0_i32 = arith.constant 0 : i32
    %c0_i32_0 = arith.constant 0 : i32
    %c0_i32_1 = arith.constant 0 : i32
    return %c0_i32, %c0_i32_0 : i32, i32
  }
  func.func @transform_14(%arg0: i32) -> (i32, i32) {
    %c0_i32 = arith.constant 0 : i32
    %c0_i32_0 = arith.constant 0 : i32
    %c0_i32_1 = arith.constant 0 : i32
    return %c0_i32, %c0_i32_0 : i32, i32
  }
  func.func @transform_15(%arg0: i32) -> (i32, i32) {
    %c0_i32 = arith.constant 0 : i32
    %c0_i32_0 = arith.constant 0 : i32
    %c0_i32_1 = arith.constant 0 : i32
    return %c0_i32, %c0_i32_0 : i32, i32
  }
  func.func @transform_16(%arg0: i32) -> (i32, i32) {
    %c0_i32 = arith.constant 0 : i32
    %c0_i32_0 = arith.constant 0 : i32
    %c0_i32_1 = arith.constant 0 : i32
    return %c0_i32, %c0_i32_0 : i32, i32
  }
}

</mosaic_0001>

<bundles_post_ra>
// kernel: pred_model_forward_train.1
= control target key start
LH: loop header
LB: loop body
LE: loop exit
PB: predicated region body
PF: predicated region fallthrough
CT: control target
= control target key end

     0   :  { %s1410_s0 = inlined_call_operand.vmem [shape: bf16[16,16], index: 0, kind: input, shape index: {}]   ;;  %s1411_s1 = inlined_call_operand.vmem [shape: bf16[16,16], index: 1, kind: input, shape index: {}]   ;;  %s1412_s2 = inlined_call_operand.vmem [shape: s32[8,2], index: 2, kind: input, shape index: {}]   ;;  %s1413_s3 = inlined_call_operand.<no memory space> [shape: f32[1,1], index: 3, kind: input, shape index: {}]   ;;  %s1414_s4 = inlined_call_operand.vmem [shape: bf16[16,32], index: 4, kind: input, shape index: {}]   ;;  %s1415_s5 = inlined_call_operand.vmem [shape: f32[1,32], index: 5, kind: input, shape index: {}]   ;;  %s1416_s6 = inlined_call_operand.vmem [shape: bf16[16,32], index: 6, kind: input, shape index: {}]   ;;  %s1417_s7 = inlined_call_operand.vmem [shape: f32[1,32], index: 7, kind: input, shape index: {}]   ;;  %s1418_s8 = inlined_call_operand.vmem [shape: bf16[32,64], index: 8, kind: input, shape index: {}]   ;;  %s1419_s9 = inlined_call_operand.vmem [shape: f32[1,64], index: 9, kind: input, shape index: {}]   ;;  %s1420_s10 = inlined_call_operand.vmem [shape: bf16[64,32], index: 10, kind: input, shape index: {}]   ;;  %s1421_s11 = inlined_call_operand.vmem [shape: f32[1,32], index: 11, kind: input, shape index: {}]   ;;  %s1422_s12 = inlined_call_operand.vmem [shape: bf16[32,128], index: 12, kind: input, shape index: {}]   ;;  %s1423_s13 = inlined_call_operand.vmem [shape: bf16[32,128], index: 13, kind: input, shape index: {}]   ;;  %s1424_s14 = inlined_call_operand.vmem [shape: f32[1,128], index: 14, kind: input, shape index: {}]   ;;  %s1425_s15 = inlined_call_operand.hbm [shape: f32[1,1], index: 15, kind: output, shape index: {0}]   ;;  %s1426_s16 = inlined_call_operand.vmem [shape: f32[8,128], index: 16, kind: output, shape index: {1}]  }
   0x1   :  { %1427 = sst [smem:[#allocation9_spill]] %s1410_s0 }
   0x2   :  { %v1063_v0 = vld [vmem:[%s1414_s4] sm:$0xff]   ;;  %v1115_v1 = vmov 0.0   ;;  %s1428_s25 = sld [smem:[#allocation9_spill]]  ;;  %vm1116_vm0 = vmmov 0   ;;  %vm92_vm1 = vcmask 130048  }
   0x3   :  { %964 = vmatprep.subr.bf16.mxu0 %v1115_v1  ;;  %970 = vmatprep.subr.bf16.mxu1 %v1115_v1  ;;  %v1065_v3 = vld [vmem:[%s1411_s1] sm:$0xff]  }
   0x4   :  { %965 = vmatpush3.bf16.msra.mxu0 %v1063_v0  ;;  %966 = vmatprep.mubr.msk.bf16.mxu0 %vm1116_vm0, %v1115_v1  ;;  %v1066_v4 = vld [vmem:[%s1416_s6] sm:$0xff]  }
   0x5   :  { %971 = vmatpush3.bf16.msra.mxu1 %v1063_v0  ;;  %972 = vmatprep.mubr.msk.bf16.mxu1 %vm1116_vm0, %v1115_v1 }
   0x6   :  { %982 = vmatprep.subr.bf16.mxu1 %v1115_v1  ;;  %976 = vmatprep.subr.bf16.mxu0 %v1115_v1 }
   0x8   :  { %v1064_v2 = vld [vmem:[%s1428_s25] sm:$0xff]   ;;  %973 = vmatmul.mubr.msk.bf16.vlgmr.msra.gmra.mxu1 %vm92_vm1, %v1065_v3 }
   0x9   :  { %967 = vmatmul.mubr.msk.bf16.vlgmr.msra.gmra.mxu0 %vm92_vm1, %v1064_v2  ;;  %983 = vmatpush3.bf16.msra.mxu1 %v1066_v4 }
   0xa   :  { %977 = vmatpush3.bf16.msra.mxu0 %v1066_v4  ;;  %984 = vmatprep.mubr.msk.bf16.mxu1 %vm1116_vm0, %v1115_v1 }
   0xb   :  { %978 = vmatprep.mubr.msk.bf16.mxu0 %vm1116_vm0, %v1115_v1  ;;  %988 = vmatprep.subr.bf16.mxu0 %v1115_v1 }
   0xc   :  { %996 = vmatprep.subr.bf16.mxu1 %v1115_v1 }
   0xd   :  { %23 = vsyncpa [#allocation7], 0  ;;  %v1067_v5 = vld [vmem:[%s1418_s8 + $0x8] sm:$0xff]   ;;  %v1068_v6 = vld [vmem:[%s1418_s8] sm:$0xff]   ;;  %vm61_vm2 = vcmask 261120   ;;  %v1117_v8 = vmov 0   ;;  %v351_v50 = vstv %s1413_s3  ;;  %v631_v52 = vlaneseq }
   0xe   :  { %62 = vst.msk [vmem:[#allocation3] sm:$0xff] %vm61_vm2, %v1115_v1  ;;  %63 = vst.msk [vmem:[#allocation4] sm:$0xff] %vm61_vm2, %v1115_v1  ;;  %v630_v7 = vld [vmem:[%s1412_s2] sm:$0xff]  ;;  %1061 = vset.pattern.permute.xlu0 %v1117_v8  ;;  %v1069_v36 = vld [vmem:[%s1420_s10 + $0x18] sm:$0xff]   ;;  %v1118_v40 = vmov 1   ;;  %vm396_vm5 = vcmask 523264  }
   0xf   :  { %637 = vperm.xlu0 %1061, %v630_v7   ;;  %v897_v11 = vld [vmem:[%s1415_s5] ss:$0 sm:$0xff]  ;;  %v1070_v38 = vld [vmem:[%s1420_s10 + $0x10] sm:$0xff]   ;;  %v1071_v39 = vld [vmem:[%s1420_s10 + $0x8] sm:$0xff]   ;;  %v632_v57 = vand.u32 127, %v631_v52  ;;  %vm59_vm10 = vcmask 0  }
  0x10   :  { %985 = vmatmul.mubr.msk.bf16.vlgmr.msra.gmra.mxu1 %vm92_vm1, %v1065_v3  ;;  %v1262_v21 = vld [vmem:[%s1417_s7] ss:$0 sm:$0xff]  ;;  %60 = vst.msk [vmem:[#allocation2] sm:$0x1] %vm59_vm10, %v1115_v1 }
  0x11   :  { %979 = vmatmul.mubr.msk.bf16.vlgmr.msra.gmra.mxu0 %vm92_vm1, %v1064_v2  ;;  %1004 = vmatprep.mubr.msk.bf16.mxu1 %vm1116_vm0, %v1115_v1  ;;  %v1072_v41 = vld [vmem:[%s1420_s10] sm:$0xff]  }
  0x12   :  { %992 = vmatprep.mubr.msk.bf16.mxu0 %vm1116_vm0, %v1115_v1  ;;  %989 = vmatpush3.bf16.msra.mxu0 %v1067_v5  ;;  %v907_v47 = vld [vmem:[%s1419_s9] ss:$0 sm:$0xff] }
  0x13   :  { %990 = vmatprep.subr.bf16.mxu0 %v1115_v1  ;;  %997 = vmatpush3.bf16.msra.mxu1 %v1069_v36 }
  0x14   :  { %998 = vmatprep.subr.bf16.mxu1 %v1115_v1  ;;  %1062 = vset.pattern.permute.xlu0 %v1118_v40 }
  0x15   :  { %644 = vperm.xlu0 %1062, %v630_v7  }
  0x16   :  { %991 = vmatpush3.bf16.msra.mxu0 %v1068_v6 }
  0x17   :  { %1008 = vmatprep.subr.bf16.mxu0 %v1115_v1  ;;  %999 = vmatpush3.bf16.msra.mxu1 %v1070_v38 }
  0x18   :  { %1000 = vmatprep.subr.bf16.mxu1 %v1115_v1 }
  0x1b   :  { %1001 = vmatpush3.bf16.msra.mxu1 %v1071_v39 }
  0x1c   :  { %1002 = vmatprep.subr.bf16.mxu1 %v1115_v1 }
  0x1f   :  { %1003 = vmatpush3.bf16.msra.mxu1 %v1072_v41 }
  0x20   :  { %1028 = vmatprep.subr.bf16.mxu1 %v1115_v1 }
  0x8a   :  { %v638_v59 = vpop.permute.xlu0 %637 }
  0x8b   :  { %vm639_vm6 = vcmp.eq.s32.totalorder %v632_v57, %v638_v59 }
  0xc8   :  { %v179_v10 = vpop.f32.mrf.mxu1 }
  0xc9   :  { %v130_v9 = vpop.f32.mrf.mxu0  ;;  %v180_v27 = vadd.f32 %v897_v11, %v179_v10 }
  0xca   :  { %v974_v13 = vpop.f32.mrf.mxu1  ;;  %v131_v15 = vadd.f32 %v897_v11, %v130_v9  ;;  %v645_v9 = vpop.permute.xlu0 %644 }
  0xcb   :  { %v968_v12 = vpop.f32.mrf.mxu0  ;;  %vm646_vm9 = vcmp.eq.s32.totalorder %v632_v57, %v645_v9 }
  0xcc   :  { %v182_v17 = vpop.f32.mrf.mxu1 }
  0xcd   :  { %v133_v14 = vpop.f32.mrf.mxu0  ;;  %v183_v28 = vadd.f32 %v897_v11, %v182_v17  ;;  %v1075_v17 = vld [vmem:[%s1423_s13 + $0x8] sm:$0xff]  }
  0xce   :  { %v134_v16 = vadd.f32 %v897_v11, %v133_v14  ;;  %v975_v20 = vpop.f32.mrf.mxu1  ;;  %v920_v14 = vsel %vm646_vm9, 1.0, %v1115_v1 }
  0xcf   :  { %v969_v18 = vpop.f32.mrf.mxu0  ;;  %v441_v33 = vpack.c.bf16 %v183_v28, %v180_v27 }
  0xd0   :  { %v1257_v19 = vpack.c.bf16 %v134_v16, %v131_v15  ;;  %v273_v23 = vpop.f32.mrf.mxu1  ;;  %v649_v15 = vpack.c.bf16 %v920_v14, %v920_v14  ;;  %v1073_v16 = vld [vmem:[%s1422_s12 + $0x8] sm:$0xff]   ;;  %v1074_v18 = vld [vmem:[%s1422_s12] sm:$0xff]  }
  0xd1   :  { %v232_v22 = vpop.f32.mrf.mxu0  ;;  %v1272_v25 = vadd.f32 %v1262_v21, %v273_v23 }
  0xd2   :  { %993 = vmatmul.mubr.msk.bf16.vlgmr.msra.gmra.mxu0 %vm61_vm2, %v1257_v19  ;;  %v1267_v24 = vadd.f32 %v1262_v21, %v232_v22  ;;  %v986_v29 = vpop.f32.mrf.mxu1 }
  0xd3   :  { %1009 = vmatpush3.bf16.msra.mxu0 %v1067_v5  ;;  %1012 = vmatprep.mubr.msk.bf16.mxu0 %vm1116_vm0, %v1115_v1  ;;  %v980_v26 = vpop.f32.mrf.mxu0  ;;  %v549_v30 = vmul.f32 %v1272_v25, %v1272_v25 }
  0xd4   :  { %1010 = vmatprep.subr.bf16.mxu0 %v1115_v1  ;;  %v589_v31 = vmul.f32 %v1267_v24, %v1267_v24  ;;  %v276_v42 = vpop.f32.mrf.mxu1 }
  0xd5   :  { %v551_v32 = vsel %vm61_vm2, %v549_v30, 0.0  ;;  %v1285_v35 = vpop.f32.mrf.mxu0  ;;  %v1308_v44 = vadd.f32 %v1262_v21, %v276_v42 }
  0xd6   :  { %552 = vadd.xlane.f32.xlu1 %v551_v32  ;;  %v591_v34 = vsel %vm61_vm2, %v589_v31, 0.0  ;;  %v987_v43 = vpop.f32.mrf.mxu1  ;;  %v650_v31 = vld [vmem:[#allocation3] sm:$0xff] }
  0xd7   :  { %1011 = vmatpush3.bf16.msra.mxu0 %v1068_v6  ;;  %v981_v37 = vpop.f32.mrf.mxu0  ;;  %v550_v45 = vmul.f32 %v1308_v44, %v1308_v44  ;;  %v919_v6 = vsel %vm639_vm6, 1.0, %v1115_v1 }
  0xd8   :  { %1016 = vmatprep.subr.bf16.mxu0 %v1115_v1  ;;  %v642_v10 = vpack.c.bf16 %v919_v6, %v919_v6 }
  0xd9   :  { %v554_v46 = vsel %vm61_vm2, %v550_v45, 0.0  ;;  %v1368_v45 = vadd.f32 %v1262_v21, %v1285_v35 }
  0xda   :  { %1013 = vmatmul.mubr.msk.bf16.vlgmr.msra.gmra.mxu0 %vm61_vm2, %v441_v33  ;;  %592 = vadd.xlane.f32.xlu1 %v591_v34 }
  0xdb   :  { %1024 = vmatprep.mubr.msk.bf16.mxu0 %vm1116_vm0, %v1115_v1  ;;  %1017 = vmatpush3.bf16.msra.mxu0 %v1069_v36  ;;  %v590_v35 = vmul.f32 %v1368_v45, %v1368_v45 }
  0xdc   :  { %1018 = vmatprep.subr.bf16.mxu0 %v1115_v1  ;;  %555 = vadd.xlane.f32.xlu0 %v554_v46 }
  0xdd   :  { %v594_v59 = vsel %vm61_vm2, %v590_v35, 0.0 }
  0xdf   :  { %1019 = vmatpush3.bf16.msra.mxu0 %v1070_v38 }
  0xe0   :  { %1020 = vmatprep.subr.bf16.mxu0 %v1115_v1 }
  0xe3   :  { %1021 = vmatpush3.bf16.msra.mxu0 %v1071_v39 }
  0xe4   :  { %1022 = vmatprep.subr.bf16.mxu0 %v1115_v1 }
  0xe7   :  { %1023 = vmatpush3.bf16.msra.mxu0 %v1072_v41 }
  0xe8   :  { %1040 = vmatprep.subr.bf16.mxu0 %v1115_v1 }
 0x192   :  { %v342_v48 = vpop.f32.mrf.mxu0 }
 0x193   :  { %v343_v49 = vadd.f32 %v907_v47, %v342_v48 }
 0x194   :  { %v994_v51 = vpop.f32.mrf.mxu0 }
 0x195   :  { %v352_v54 = vmul.f32 %v351_v50, %v343_v49  ;;  %vm349_vm3 = vcmp.ge.f32.partialorder %v343_v49, 0.0  ;;  %v1076_v51 = vld [vmem:[%s1423_s13] sm:$0xff]  }
 0x196   :  { %v345_v53 = vpop.f32.mrf.mxu0 }
 0x197   :  { %v346_v55 = vadd.f32 %v907_v47, %v345_v53  ;;  %v354_v61 = vsel %vm349_vm3, %v343_v49, %v352_v54 }
 0x198   :  { %v995_v56 = vpop.f32.mrf.mxu0 }
 0x199   :  { %vm350_vm4 = vcmp.ge.f32.partialorder %v346_v55, 0.0  ;;  %v353_v58 = vmul.f32 %v351_v50, %v346_v55 }
 0x19a   :  { %v479_v60 = vpop.f32.mrf.mxu0 }
 0x19b   :  { %v355_v62 = vsel %vm350_vm4, %v346_v55, %v353_v58  ;;  %v480_v63 = vadd.f32 %v907_v47, %v479_v60 }
 0x19c   :  { %v356_v0 = vpack.c.bf16 %v355_v62, %v354_v61  ;;  %v1014_v2 = vpop.f32.mrf.mxu0 }
 0x19d   :  { %v488_v4 = vmul.f32 %v480_v63, %v351_v50  ;;  %vm486_vm7 = vcmp.ge.f32.partialorder %v480_v63, 0.0 }
 0x19e   :  { %1005 = vmatmul.mubr.msk.bf16.vlgmr.msra.gmra.mxu1 %vm396_vm5, %v356_v0  ;;  %v482_v3 = vpop.f32.mrf.mxu0 }
 0x19f   :  { %v483_v5 = vadd.f32 %v907_v47, %v482_v3  ;;  %1029 = vmatpush3.bf16.msra.mxu1 %v1257_v19  ;;  %1030 = vmatprep.mubr.msk.bf16.mxu1 %vm1116_vm0, %v1115_v1  ;;  %v490_v11 = vsel %vm486_vm7, %v480_v63, %v488_v4  ;;  %v553_v63 = vpop.xlane.xlu1 %552  ;;  %v556_v3 = vpop.xlane.xlu0 %555 }
 0x1a0   :  { %v1015_v7 = vpop.f32.mrf.mxu0  ;;  %1034 = vmatprep.subr.bf16.mxu1 %v1115_v1  ;;  %v557_v2 = vmax.f32 %v553_v63, 1e-24 }
 0x1a1   :  { %vm487_vm8 = vcmp.ge.f32.partialorder %v483_v5, 0.0  ;;  %v489_v8 = vmul.f32 %v483_v5, %v351_v50  ;;  %v696_v50 = vld [vmem:[#allocation4] sm:$0xff] }
 0x1a2   :  { %1077 = vrsqrt.f32 %v557_v2 }
 0x1a3   :  { %v491_v12 = vsel %vm487_vm8, %v483_v5, %v489_v8  ;;  %v593_v0 = vpop.xlane.xlu1 %592  ;;  %v558_v5 = vmax.f32 %v556_v3, 1e-24 }
 0x1a4   :  { %v492_v13 = vpack.c.bf16 %v491_v12, %v490_v11  ;;  %v597_v8 = vmax.f32 %v593_v0, 1e-24 }
 0x1a6   :  { %1025 = vmatmul.mubr.msk.bf16.vlgmr.msra.gmra.mxu0 %vm396_vm5, %v492_v13  ;;  %1031 = vmatmul.mubr.msk.bf16.vlgmr.msra.gmra.mxu1 %vm92_vm1, %v642_v10 }
 0x1a7   :  { %1035 = vmatpush3.bf16.msra.mxu1 %v1257_v19  ;;  %1036 = vmatprep.mubr.msk.bf16.mxu1 %vm1116_vm0, %v1115_v1  ;;  %v911_v19 = vld [vmem:[%s1421_s11] ss:$0 sm:$0xff] }
 0x1a8   :  { %1048 = vmatprep.subr.bf16.mxu1 %v1115_v1  ;;  %1044 = vmatprep.mubr.msk.bf16.mxu0 %vm1116_vm0, %v1115_v1 }
 0x1a9   :  { %1041 = vmatpush3.bf16.msra.mxu0 %v1075_v17 }
 0x1aa   :  { %1042 = vmatprep.subr.bf16.mxu0 %v1115_v1 }
 0x1ad   :  { %1043 = vmatpush3.bf16.msra.mxu0 %v1076_v51 }
 0x1ae   :  { %1037 = vmatmul.mubr.msk.bf16.vlgmr.msra.gmra.mxu1 %vm92_vm1, %v649_v15 }
 0x1af   :  { %1052 = vmatprep.mubr.msk.bf16.mxu1 %vm1116_vm0, %v1115_v1  ;;  %1049 = vmatpush3.bf16.msra.mxu1 %v1073_v16  ;;  %v1078_v14 = vpop.eup %1077 }
 0x1b0   :  { %1050 = vmatprep.subr.bf16.mxu1 %v1115_v1 }
 0x1b3   :  { %1051 = vmatpush3.bf16.msra.mxu1 %v1074_v18 }
 0x25e   :  { %v434_v20 = vpop.f32.mrf.mxu1 }
 0x25f   :  { %v1351_v22 = vadd.f32 %v911_v19, %v434_v20 }
 0x260   :  { %v1006_v23 = vpop.f32.mrf.mxu1 }
 0x261   :  { %v537_v26 = vmul.f32 %v1351_v22, %v1351_v22 }
 0x262   :  { %v437_v27 = vpop.f32.mrf.mxu1 }
 0x263   :  { %v1355_v28 = vadd.f32 %v911_v19, %v437_v27  ;;  %v539_v29 = vsel %vm61_vm2, %v537_v26, 0.0 }
 0x264   :  { %540 = vadd.xlane.f32.xlu1 %v539_v29  ;;  %v1007_v30 = vpop.f32.mrf.mxu1 }
 0x265   :  { %v538_v32 = vmul.f32 %v1355_v28, %v1355_v28 }
 0x266   :  { %v530_v33 = vpop.f32.mrf.mxu0  ;;  %v688_v34 = vpop.f32.mrf.mxu1 }
 0x267   :  { %v1360_v36 = vadd.f32 %v911_v19, %v530_v33  ;;  %v542_v37 = vsel %vm61_vm2, %v538_v32, 0.0  ;;  %v694_v38 = vadd.f32 %v688_v34, %v650_v31 }
 0x268   :  { %543 = vadd.xlane.f32.xlu1 %v542_v37  ;;  %v1026_v39 = vpop.f32.mrf.mxu0  ;;  %v1032_v40 = vpop.f32.mrf.mxu1 }
 0x269   :  { %v577_v41 = vmul.f32 %v1360_v36, %v1360_v36  ;;  %695 = vst.msk [vmem:[#allocation3] sm:$0xff] %vm61_vm2, %v694_v38 }
 0x26a   :  { %v533_v42 = vpop.f32.mrf.mxu0  ;;  %v691_v43 = vpop.f32.mrf.mxu1 }
 0x26b   :  { %v1370_v46 = vadd.f32 %v911_v19, %v533_v42  ;;  %v579_v47 = vsel %vm61_vm2, %v577_v41, 0.0  ;;  %v563_v19 = vmul.f32 %v1078_v14, %v1272_v25 }
 0x26c   :  { %580 = vadd.xlane.f32.xlu1 %v579_v47  ;;  %v1027_v48 = vpop.f32.mrf.mxu0  ;;  %v1033_v49 = vpop.f32.mrf.mxu1 }
 0x26d   :  { %v578_v52 = vmul.f32 %v1370_v46, %v1370_v46  ;;  %v929_v49 = vld [vmem:[%s1424_s14] ss:$0 sm:$0xff]  ;;  %s1119_s14 = smov [#allocation6]  }
 0x26e   :  { %v734_v53 = vpop.f32.mrf.mxu1 }
 0x26f   :  { %v582_v21 = vsel %vm61_vm2, %v578_v52, 0.0  ;;  %v740_v54 = vadd.f32 %v734_v53, %v696_v50 }
 0x270   :  { %583 = vadd.xlane.f32.xlu1 %v582_v21  ;;  %v1038_v55 = vpop.f32.mrf.mxu1  ;;  %v748_v56 = vld [vmem:[#allocation3] sm:$0xff] }
 0x271   :  { %741 = vst.msk [vmem:[#allocation4] sm:$0xff] %vm61_vm2, %v740_v54  ;;  %v749_v57 = vpack.c.bf16 %v748_v56, %v748_v56 }
 0x272   :  { %v737_v58 = vpop.f32.mrf.mxu1 }
 0x273   :  { %1053 = vmatmul.mubr.msk.bf16.vlgmr.msra.gmra.mxu1 %vm61_vm2, %v749_v57 }
 0x274   :  { %595 = vadd.xlane.f32.xlu1 %v594_v59  ;;  %v1039_v60 = vpop.f32.mrf.mxu1 }
 0x278   :  { %v754_v61 = vld [vmem:[#allocation4] sm:$0xff] }
 0x279   :  { %v755_v62 = vpack.c.bf16 %v754_v61, %v754_v61 }
 0x27b   :  { %1045 = vmatmul.mubr.msk.bf16.vlgmr.msra.gmra.mxu0 %vm61_vm2, %v755_v62 }
 0x2ed   :  { %v541_v4 = vpop.xlane.xlu1 %540 }
 0x2ee   :  { %v545_v6 = vmax.f32 %v541_v4, 1e-24 }
 0x2f0   :  { %1079 = vrsqrt.f32 %v545_v6 }
 0x2f1   :  { %v544_v7 = vpop.xlane.xlu1 %543  ;;  %1081 = vrsqrt.f32 %v558_v5 }
 0x2f2   :  { %v546_v9 = vmax.f32 %v544_v7, 1e-24  ;;  %v619_v7 = vld [vmem:[#allocation2] sm:$0x1] }
 0x2f4   :  { %1083 = vrsqrt.f32 %v546_v9 }
 0x2f5   :  { %v581_v10 = vpop.xlane.xlu1 %580  ;;  %1085 = vrsqrt.f32 %v597_v8 }
 0x2f6   :  { %v585_v11 = vmax.f32 %v581_v10, 1e-24 }
 0x2f8   :  { %1087 = vrsqrt.f32 %v585_v11 }
 0x2f9   :  { %v584_v12 = vpop.xlane.xlu1 %583 }
 0x2fa   :  { %v586_v13 = vmax.f32 %v584_v12, 1e-24 }
 0x2fc   :  { %1089 = vrsqrt.f32 %v586_v13 }
 0x2fd   :  { %v1080_v15 = vpop.eup %1079  ;;  %v596_v16 = vpop.xlane.xlu1 %595 }
 0x2fe   :  { %v598_v17 = vmax.f32 %v596_v16, 1e-24  ;;  %v561_v18 = vmul.f32 %v1080_v15, %v1351_v22  ;;  %v1082_v20 = vpop.eup %1081 }
 0x2ff   :  { %v564_v30 = vmul.f32 %v1082_v20, %v1308_v44 }
 0x300   :  { %1091 = vrsqrt.f32 %v598_v17  ;;  %v565_v23 = vmul.f32 %v563_v19, %v561_v18 }
 0x301   :  { %v1084_v26 = vpop.eup %1083 }
 0x302   :  { %v567_v27 = vsel %vm61_vm2, %v565_v23, 0.0  ;;  %v562_v29 = vmul.f32 %v1084_v26, %v1355_v28  ;;  %v1086_v31 = vpop.eup %1085 }
 0x303   :  { %568 = vadd.xlane.f32.xlu1 %v567_v27  ;;  %v603_v25 = vmul.f32 %v1086_v31, %v1267_v24 }
 0x304   :  { %v566_v32 = vmul.f32 %v564_v30, %v562_v29 }
 0x305   :  { %v1088_v33 = vpop.eup %1087 }
 0x306   :  { %v570_v34 = vsel %vm61_vm2, %v566_v32, 0.0  ;;  %v601_v22 = vmul.f32 %v1088_v33, %v1360_v36 }
 0x307   :  { %571 = vadd.xlane.f32.xlu1 %v570_v34 }
 0x308   :  { %v605_v37 = vmul.f32 %v603_v25, %v601_v22 }
 0x309   :  { %v1090_v39 = vpop.eup %1089 }
 0x30a   :  { %v607_v38 = vsel %vm61_vm2, %v605_v37, 0.0  ;;  %v602_v28 = vmul.f32 %v1090_v39, %v1370_v46 }
 0x30b   :  { %608 = vadd.xlane.f32.xlu1 %v607_v38 }
 0x30d   :  { %v1092_v40 = vpop.eup %1091 }
 0x30e   :  { %v604_v44 = vmul.f32 %v1092_v40, %v1368_v45 }
 0x310   :  { %v606_v41 = vmul.f32 %v604_v44, %v602_v28 }
 0x312   :  { %v610_v42 = vsel %vm61_vm2, %v606_v41, 0.0 }
 0x313   :  { %611 = vadd.xlane.f32.xlu1 %v610_v42 }
 0x333   :  { %v864_v24 = vpop.f32.mrf.mxu1 }
 0x335   :  { %v1054_v36 = vpop.f32.mrf.mxu1 }
 0x337   :  { %v867_v43 = vpop.f32.mrf.mxu1 }
 0x339   :  { %v1055_v47 = vpop.f32.mrf.mxu1 }
 0x33b   :  { %v809_v48 = vpop.f32.mrf.mxu0 }
 0x33c   :  { %v865_v46 = vadd.f32 %v864_v24, %v809_v48 }
 0x33d   :  { %v1046_v50 = vpop.f32.mrf.mxu0 }
 0x33e   :  { %v877_v45 = vadd.f32 %v929_v49, %v865_v46 }
 0x33f   :  { %v812_v51 = vpop.f32.mrf.mxu0 }
 0x340   :  { %878 = vst [vmem:[%s1426_s16] sm:$0xff] %v877_v45  ;;  %s885_s16 = sshll.u32 %s1119_s14, 4  ;;  %s886_s16 = int_to_ptr.vmem [resolvable:$true] %s885_s16 }
 0x341   :  { %v1047_v52 = vpop.f32.mrf.mxu0  ;;  %s1093_s2 = scalar_lea.vmem %s886_s16, 16  ;;  %s1097_s19 = scalar_lea.vmem %s886_s16, 32 }
 0x342   :  { %p1094_p0 = scmp.ne.s32.totalorder %s886_s16, %s1093_s2  ;;  %p1098_p1 = scmp.lt.s32.totalorder %s886_s16, %s886_s16 }
 0x343   :  { %p1099_p2 = scmp.lt.s32.totalorder %s1097_s19, %s1093_s2 }
 0x345   :  { %p1100_p3 = por %p1099_p2, %p1098_p1 }
 0x347   :  { %p1101_p4 = pnand %p1100_p3, %p1094_p0 }
 0x38c   :  { %v569_v53 = vpop.xlane.xlu1 %568 }
 0x38d   :  { %v573_v54 = vmul.f32 2.0, %v569_v53 }
 0x38f   :  { %v575_v59 = vsub.f32 2.0, %v573_v54 }
 0x390   :  { %v572_v1 = vpop.xlane.xlu1 %571 }
 0x391   :  { %v574_v55 = vmul.f32 2.0, %v572_v1 }
 0x393   :  { %v576_v60 = vsub.f32 2.0, %v574_v55 }
 0x394   :  { %v609_v21 = vpop.xlane.xlu1 %608 }
 0x395   :  { %v613_v35 = vmul.f32 2.0, %v609_v21 }
 0x397   :  { %v615_v57 = vsub.f32 2.0, %v613_v35 }
 0x399   :  { %v617_v62 = vadd.f32 %v615_v57, %v575_v59 }
 0x39c   :  { %v612_v56 = vpop.xlane.xlu1 %611 }
 0x39d   :  { %v614_v58 = vmul.f32 2.0, %v612_v56 }
 0x39f   :  { %v616_v61 = vsub.f32 2.0, %v614_v58 }
 0x3a1   :  { %v618_v63 = vadd.f32 %v616_v61, %v576_v60 }
 0x3a3   :  { %v620_v0 = vadd.f32 %v618_v63, %v617_v62 }
 0x3a5   :  { %v621_v2 = vrot.slane %v620_v0, 4 }
 0x3a7   :  { %v622_v3 = vadd.f32 %v621_v2, %v620_v0 }
 0x3a9   :  { %v623_v4 = vrot.slane %v622_v3, 2 }
 0x3ab   :  { %v624_v5 = vadd.f32 %v623_v4, %v622_v3 }
 0x3ad   :  { %v625_v6 = vrot.slane %v624_v5, 1 }
 0x3af   :  { %v626_v8 = vadd.f32 %v625_v6, %v624_v5 }
 0x3b1   :  { %v627_v9 = vadd.f32 %v626_v8, %v619_v7 }
 0x3b3   :  { %629 = vst.msk [vmem:[#allocation2] sm:$0x1] %vm59_vm10, %v627_v9 }
 0x3ba   :  { %v745_v10 = vld [vmem:[#allocation2] sm:$0x1] }
 0x3bb   :  { %v746_v11 = vmul.f32 0.0625, %v745_v10 }
 0x3bd   :  { %747 = vst.msk [vmem:[#allocation6] sm:$0x1] %vm59_vm10, %v746_v11 }
 0x3be   :  { %1104 = shalt.err (!%p1101_p4)
}
 0x3bf   :  { %888 = dma.vmem_to_hbm [thread:$0]  %s886_s16, 16, %s1425_s15, [#allocation7]  }
 0x3c0   :  { %1113 = dma.done.wait [#allocation7], 16  }
 0x3c1   :  { %1114 = vsyncadd [#allocation7], 4294967280 }
 0x3c2   :  { %896 = vsyncpa [#allocation7], 1 }

</bundles_post_ra>
